<compile_context>
chip_gen: v5e
topology: v5e:2x2
jax: 0.10.0
libtpu: 0.0.40
codegen_flags: <defaults>
</compile_context>

<pallas_src>
import jax
import jax.numpy as jnp
import numpy as np
from jax.experimental import pallas as pl
from jax.experimental.pallas import tpu as pltpu


def make_lstm_kernel(T, Bp, D, H):
    """Kernel over one time-chunk of T steps, batch padded to Bp."""

    def lstm_kernel(x_ref, wihT_ref, whhT_ref, b_ref, out_ref, h_ref, c_ref):
        # Zero-initialize the recurrent carry on the first chunk only.
        @pl.when(pl.program_id(0) == 0)
        def _():
            h_ref[...] = jnp.zeros_like(h_ref)
            c_ref[...] = jnp.zeros_like(c_ref)

        x_blk = x_ref[...]                                    # (T, Bp, D) f32

        # Input projection for the whole chunk: one big MXU GEMM.
        #   (T*Bp, D) @ (D, 4H) + bias -> (T, Bp, 4H)
        xg = (
            jnp.dot(x_blk.reshape(T * Bp, D), wihT_ref[...],
                    preferred_element_type=jnp.float32)
            + b_ref[...]
        ).reshape(T, Bp, 4 * H)

        whhT = whhT_ref[...]                                  # (H, 4H), loop-invariant
        h = h_ref[...]                                        # (Bp, H)
        c = c_ref[...]                                        # (Bp, H)

        hs = []
        # Fully unrolled recurrence with static indices (T is small).
        for t in range(T):
            gates = xg[t] + jnp.dot(h, whhT,
                                    preferred_element_type=jnp.float32)  # (Bp, 4H)

            # PyTorch gate order: [i, f, g, o]
            i_g = jax.nn.sigmoid(gates[:, 0 * H:1 * H])
            f_g = jax.nn.sigmoid(gates[:, 1 * H:2 * H])
            g_g = jnp.tanh(gates[:, 2 * H:3 * H])
            o_g = jax.nn.sigmoid(gates[:, 3 * H:4 * H])

            c = f_g * c + i_g * g_g
            h = o_g * jnp.tanh(c)
            hs.append(h)

        h_ref[...] = h
        c_ref[...] = c

        # Fused concat([x, lstm_out], axis=-1): build the full (T, Bp, D+H) block in
        # registers and store it in one shot (single, widest-possible store).
        h_stack = jnp.stack(hs, axis=0)                       # (T, Bp, H)
        out_ref[...] = jnp.concatenate(
            [x_blk, h_stack], axis=-1).astype(out_ref.dtype)

    return lstm_kernel


def basic_unit_forward(x, params, droprate=0.0, time_chunk=16):
    """BasicUnit.forward: concat([x, LSTM(x)], axis=2), LSTM with zero initial state.

    x: (S, B, D) float32.  Returns (S, B, D + H) float32.
    Dropout: droprate=0 (or eval mode) => identity, matching the reference module
    when not training.
    """
    S, B, D = x.shape
    H = params["w_hh"].shape[1]
    assert params["w_ih"].shape == (4 * H, D)
    assert params["w_hh"].shape == (4 * H, H)

    # Pre-transpose weights once in the wrapper (loop-invariant, VMEM-resident).
    w_ihT = jnp.asarray(params["w_ih"], jnp.float32).T        # (D, 4H)
    w_hhT = jnp.asarray(params["w_hh"], jnp.float32).T        # (H, 4H)
    bias2d = (jnp.asarray(params["b_ih"], jnp.float32)
              + jnp.asarray(params["b_hh"], jnp.float32)).reshape(1, 4 * H)

    # Time chunking + batch padding (sublane = 8 for f32).
    T = max(1, min(time_chunk, S))
    Sp = ((S + T - 1) // T) * T
    Bp = ((B + 7) // 8) * 8

    if (Sp, Bp) != (S, B):
        x_p = jnp.pad(x, ((0, Sp - S), (0, Bp - B), (0, 0)))
    else:
        x_p = x

    kernel = make_lstm_kernel(T, Bp, D, H)

    out = pl.pallas_call(
        kernel,
        out_shape=jax.ShapeDtypeStruct((Sp, Bp, D + H), jnp.float32),
        grid_spec=pltpu.PrefetchScalarGridSpec(
            num_scalar_prefetch=0,
            grid=(Sp // T,),
            in_specs=[
                pl.BlockSpec((T, Bp, D), lambda i: (i, 0, 0)),      # x chunk
                pl.BlockSpec((D, 4 * H), lambda i: (0, 0)),         # W_ih.T (resident)
                pl.BlockSpec((H, 4 * H), lambda i: (0, 0)),         # W_hh.T (resident)
                pl.BlockSpec((1, 4 * H), lambda i: (0, 0)),         # combined bias
            ],
            out_specs=pl.BlockSpec((T, Bp, D + H), lambda i: (i, 0, 0)),
            scratch_shapes=[
                pltpu.VMEM((Bp, H), jnp.float32),                   # h carry
                pltpu.VMEM((Bp, H), jnp.float32),                   # c carry
            ],
        ),
        compiler_params=pltpu.CompilerParams(
            dimension_semantics=("arbitrary",),   # sequential recurrence over time
        ),
    )(x_p, w_ihT, w_hhT, bias2d)

    if (Sp, Bp) != (S, B):
        out = out[:S, :B]
    return out


def lstm_reference(x, w_ih, w_hh, bias):
    """Pure-JAX reference LSTM (zero initial state) for the correctness check."""
    S, B, D = x.shape
    H = w_hh.shape[1]
    h = jnp.zeros((B, H), jnp.float32)
    c = jnp.zeros((B, H), jnp.float32)
    outs = []
    for t in range(S):
        gates = x[t] @ w_ih.T + h @ w_hh.T + bias
        i_g = jax.nn.sigmoid(gates[:, 0 * H:1 * H])
        f_g = jax.nn.sigmoid(gates[:, 1 * H:2 * H])
        g_g = jnp.tanh(gates[:, 2 * H:3 * H])
        o_g = jax.nn.sigmoid(gates[:, 3 * H:4 * H])
        c = f_g * c + i_g * g_g
        h = o_g * jnp.tanh(c)
        outs.append(h)
    return jnp.stack(outs, axis=0)


if __name__ == "__main__":
    # Small shapes consistent with the module's forward:
    # x: (seq_len, batch, input_dim); increase_rate == hidden_dim
    seq_len, batch, input_dim, increase_rate = 8, 2, 32, 32

    key = jax.random.PRNGKey(0)
    kx, kwi, kwh, kbi, kbh = jax.random.split(key, 5)

    # PyTorch LSTM init: uniform(-1/sqrt(H), 1/sqrt(H))
    bound = 1.0 / np.sqrt(increase_rate)
    params = {
        "w_ih": jax.random.uniform(kwi, (4 * increase_rate, input_dim),
                                   jnp.float32, -bound, bound),
        "w_hh": jax.random.uniform(kwh, (4 * increase_rate, increase_rate),
                                   jnp.float32, -bound, bound),
        "b_ih": jax.random.uniform(kbi, (4 * increase_rate,),
                                   jnp.float32, -bound, bound),
        "b_hh": jax.random.uniform(kbh, (4 * increase_rate,),
                                   jnp.float32, -bound, bound),
    }
    x = jax.random.normal(kx, (seq_len, batch, input_dim), jnp.float32)

    y = basic_unit_forward(x, params, droprate=0.0)
    y = jax.block_until_ready(y)

    assert y.shape == (seq_len, batch, input_dim + increase_rate)

    # Correctness check vs. pure-JAX reference LSTM + concat.
    ref_out = lstm_reference(x, params["w_ih"], params["w_hh"],
                             params["b_ih"] + params["b_hh"])
    ref = jnp.concatenate([x, ref_out], axis=2)
    np.testing.assert_allclose(np.asarray(y), np.asarray(ref), atol=1e-5, rtol=1e-5)

    print("KERNEL_OK")
</pallas_src>

<mosaic_0001>
module attributes {stable_mosaic.version = 11 : i64} {
  func.func @lstm_kernel(%arg0: i32, %arg1: memref<8x8x32xf32, #tpu.memory_space<vmem>>, %arg2: memref<32x128xf32, #tpu.memory_space<vmem>>, %arg3: memref<32x128xf32, #tpu.memory_space<vmem>>, %arg4: memref<1x128xf32, #tpu.memory_space<vmem>>, %arg5: memref<8x8x64xf32, #tpu.memory_space<vmem>>, %arg6: memref<8x32xf32, #tpu.memory_space<vmem>>, %arg7: memref<8x32xf32, #tpu.memory_space<vmem>>) attributes {dimension_semantics = [#tpu.dimension_semantics<arbitrary>], iteration_bounds = array<i64: 1>, scalar_prefetch = 0 : i64, scratch_operands = 2 : i64, tpu.core_type = #tpu.core_type<tc>, window_params = [{transform_indices = @transform_0, window_bounds = array<i64: 8, 8, 32>}, {pipeline_mode = #tpu.pipeline_mode<synchronous>, transform_indices = @transform_1, window_bounds = array<i64: 32, 128>}, {pipeline_mode = #tpu.pipeline_mode<synchronous>, transform_indices = @transform_2, window_bounds = array<i64: 32, 128>}, {pipeline_mode = #tpu.pipeline_mode<synchronous>, transform_indices = @transform_3, window_bounds = array<i64: 1, 128>}, {transform_indices = @transform_4, window_bounds = array<i64: 8, 8, 64>}]} {
    %c0_i32 = arith.constant 0 : i32
    %0 = arith.cmpi eq, %arg0, %c0_i32 : i32
    %1 = arith.extui %0 : i1 to i32
    %c0_i32_0 = arith.constant 0 : i32
    %2 = arith.cmpi ne, %1, %c0_i32_0 : i32
    scf.if %2 {
      %cst_52 = arith.constant 0.000000e+00 : f32
      %259 = vector.broadcast %cst_52 : f32 to vector<8x32xf32>
      %c0_53 = arith.constant 0 : index
      %c0_54 = arith.constant 0 : index
      %260 = vector.load %arg6[%c0_53, %c0_54] : memref<8x32xf32, #tpu.memory_space<vmem>>, vector<8x32xf32>
      tpu.vector_store %arg6[%c0_53, %c0_54], %259 {strides = array<i32>} : memref<8x32xf32, #tpu.memory_space<vmem>>, vector<8x32xf32>,
      %cst_55 = arith.constant 0.000000e+00 : f32
      %261 = vector.broadcast %cst_55 : f32 to vector<8x32xf32>
      %c0_56 = arith.constant 0 : index
      %c0_57 = arith.constant 0 : index
      %262 = vector.load %arg7[%c0_56, %c0_57] : memref<8x32xf32, #tpu.memory_space<vmem>>, vector<8x32xf32>
      tpu.vector_store %arg7[%c0_56, %c0_57], %261 {strides = array<i32>} : memref<8x32xf32, #tpu.memory_space<vmem>>, vector<8x32xf32>,
    } else {
    }
    %c0 = arith.constant 0 : index
    %c0_1 = arith.constant 0 : index
    %c0_2 = arith.constant 0 : index
    %3 = vector.load %arg1[%c0, %c0_1, %c0_2] : memref<8x8x32xf32, #tpu.memory_space<vmem>>, vector<8x8x32xf32>
    %4 = vector.shape_cast %3 : vector<8x8x32xf32> to vector<64x32xf32>
    %c0_3 = arith.constant 0 : index
    %c0_4 = arith.constant 0 : index
    %5 = vector.load %arg2[%c0_3, %c0_4] : memref<32x128xf32, #tpu.memory_space<vmem>>, vector<32x128xf32>
    %cst = arith.constant dense<0.000000e+00> : vector<64x128xf32>
    %6 = tpu.matmul %4, %5, %cst {dimension_numbers = #tpu.dot_dimension_numbers<[1], [0], [0], [1], [0, 0, 1, 1], [], []>} : vector<64x32xf32>, vector<32x128xf32>, vector<64x128xf32> -> vector<64x128xf32>
    %c0_5 = arith.constant 0 : index
    %c0_6 = arith.constant 0 : index
    %7 = vector.load %arg4[%c0_5, %c0_6] : memref<1x128xf32, #tpu.memory_space<vmem>>, vector<1x128xf32>
    %8 = vector.broadcast %7 : vector<1x128xf32> to vector<64x128xf32>
    %9 = arith.addf %6, %8 : vector<64x128xf32>
    %10 = vector.shape_cast %9 : vector<64x128xf32> to vector<8x8x128xf32>
    %c0_7 = arith.constant 0 : index
    %c0_8 = arith.constant 0 : index
    %11 = vector.load %arg3[%c0_7, %c0_8] : memref<32x128xf32, #tpu.memory_space<vmem>>, vector<32x128xf32>
    %c0_9 = arith.constant 0 : index
    %c0_10 = arith.constant 0 : index
    %12 = vector.load %arg6[%c0_9, %c0_10] : memref<8x32xf32, #tpu.memory_space<vmem>>, vector<8x32xf32>
    %c0_11 = arith.constant 0 : index
    %c0_12 = arith.constant 0 : index
    %13 = vector.load %arg7[%c0_11, %c0_12] : memref<8x32xf32, #tpu.memory_space<vmem>>, vector<8x32xf32>
    %14 = vector.extract_strided_slice %10 {offsets = [0, 0, 0], sizes = [1, 8, 128], strides = [1, 1, 1]} : vector<8x8x128xf32> to vector<1x8x128xf32>
    %15 = vector.shape_cast %14 : vector<1x8x128xf32> to vector<8x128xf32>
    %cst_13 = arith.constant dense<0.000000e+00> : vector<8x128xf32>
    %16 = tpu.matmul %12, %11, %cst_13 {dimension_numbers = #tpu.dot_dimension_numbers<[1], [0], [0], [1], [0, 0, 1, 1], [], []>} : vector<8x32xf32>, vector<32x128xf32>, vector<8x128xf32> -> vector<8x128xf32>
    %17 = arith.addf %15, %16 : vector<8x128xf32>
    %18 = vector.extract_strided_slice %17 {offsets = [0, 0], sizes = [8, 32], strides = [1, 1]} : vector<8x128xf32> to vector<8x32xf32>
    %19 = arith.negf %18 : vector<8x32xf32>
    %20 = math.exp %19 : vector<8x32xf32>
    %cst_14 = arith.constant 1.000000e+00 : f32
    %21 = vector.broadcast %cst_14 : f32 to vector<8x32xf32>
    %22 = arith.addf %21, %20 : vector<8x32xf32>
    %23 = arith.divf %21, %22 : vector<8x32xf32>
    %24 = vector.extract_strided_slice %17 {offsets = [0, 32], sizes = [8, 32], strides = [1, 1]} : vector<8x128xf32> to vector<8x32xf32>
    %25 = arith.negf %24 : vector<8x32xf32>
    %26 = math.exp %25 : vector<8x32xf32>
    %cst_15 = arith.constant 1.000000e+00 : f32
    %27 = vector.broadcast %cst_15 : f32 to vector<8x32xf32>
    %28 = arith.addf %27, %26 : vector<8x32xf32>
    %29 = arith.divf %27, %28 : vector<8x32xf32>
    %30 = vector.extract_strided_slice %17 {offsets = [0, 64], sizes = [8, 32], strides = [1, 1]} : vector<8x128xf32> to vector<8x32xf32>
    %31 = math.tanh %30 : vector<8x32xf32>
    %32 = vector.extract_strided_slice %17 {offsets = [0, 96], sizes = [8, 32], strides = [1, 1]} : vector<8x128xf32> to vector<8x32xf32>
    %33 = arith.negf %32 : vector<8x32xf32>
    %34 = math.exp %33 : vector<8x32xf32>
    %cst_16 = arith.constant 1.000000e+00 : f32
    %35 = vector.broadcast %cst_16 : f32 to vector<8x32xf32>
    %36 = arith.addf %35, %34 : vector<8x32xf32>
    %37 = arith.divf %35, %36 : vector<8x32xf32>
    %38 = arith.mulf %29, %13 : vector<8x32xf32>
    %39 = arith.mulf %23, %31 : vector<8x32xf32>
    %40 = arith.addf %38, %39 : vector<8x32xf32>
    %41 = math.tanh %40 : vector<8x32xf32>
    %42 = arith.mulf %37, %41 : vector<8x32xf32>
    %43 = vector.extract_strided_slice %10 {offsets = [1, 0, 0], sizes = [1, 8, 128], strides = [1, 1, 1]} : vector<8x8x128xf32> to vector<1x8x128xf32>
    %44 = vector.shape_cast %43 : vector<1x8x128xf32> to vector<8x128xf32>
    %cst_17 = arith.constant dense<0.000000e+00> : vector<8x128xf32>
    %45 = tpu.matmul %42, %11, %cst_17 {dimension_numbers = #tpu.dot_dimension_numbers<[1], [0], [0], [1], [0, 0, 1, 1], [], []>} : vector<8x32xf32>, vector<32x128xf32>, vector<8x128xf32> -> vector<8x128xf32>
    %46 = arith.addf %44, %45 : vector<8x128xf32>
    %47 = vector.extract_strided_slice %46 {offsets = [0, 0], sizes = [8, 32], strides = [1, 1]} : vector<8x128xf32> to vector<8x32xf32>
    %48 = arith.negf %47 : vector<8x32xf32>
    %49 = math.exp %48 : vector<8x32xf32>
    %cst_18 = arith.constant 1.000000e+00 : f32
    %50 = vector.broadcast %cst_18 : f32 to vector<8x32xf32>
    %51 = arith.addf %50, %49 : vector<8x32xf32>
    %52 = arith.divf %50, %51 : vector<8x32xf32>
    %53 = vector.extract_strided_slice %46 {offsets = [0, 32], sizes = [8, 32], strides = [1, 1]} : vector<8x128xf32> to vector<8x32xf32>
    %54 = arith.negf %53 : vector<8x32xf32>
    %55 = math.exp %54 : vector<8x32xf32>
    %cst_19 = arith.constant 1.000000e+00 : f32
    %56 = vector.broadcast %cst_19 : f32 to vector<8x32xf32>
    %57 = arith.addf %56, %55 : vector<8x32xf32>
    %58 = arith.divf %56, %57 : vector<8x32xf32>
    %59 = vector.extract_strided_slice %46 {offsets = [0, 64], sizes = [8, 32], strides = [1, 1]} : vector<8x128xf32> to vector<8x32xf32>
    %60 = math.tanh %59 : vector<8x32xf32>
    %61 = vector.extract_strided_slice %46 {offsets = [0, 96], sizes = [8, 32], strides = [1, 1]} : vector<8x128xf32> to vector<8x32xf32>
    %62 = arith.negf %61 : vector<8x32xf32>
    %63 = math.exp %62 : vector<8x32xf32>
    %cst_20 = arith.constant 1.000000e+00 : f32
    %64 = vector.broadcast %cst_20 : f32 to vector<8x32xf32>
    %65 = arith.addf %64, %63 : vector<8x32xf32>
    %66 = arith.divf %64, %65 : vector<8x32xf32>
    %67 = arith.mulf %58, %40 : vector<8x32xf32>
    %68 = arith.mulf %52, %60 : vector<8x32xf32>
    %69 = arith.addf %67, %68 : vector<8x32xf32>
    %70 = math.tanh %69 : vector<8x32xf32>
    %71 = arith.mulf %66, %70 : vector<8x32xf32>
    %72 = vector.extract_strided_slice %10 {offsets = [2, 0, 0], sizes = [1, 8, 128], strides = [1, 1, 1]} : vector<8x8x128xf32> to vector<1x8x128xf32>
    %73 = vector.shape_cast %72 : vector<1x8x128xf32> to vector<8x128xf32>
    %cst_21 = arith.constant dense<0.000000e+00> : vector<8x128xf32>
    %74 = tpu.matmul %71, %11, %cst_21 {dimension_numbers = #tpu.dot_dimension_numbers<[1], [0], [0], [1], [0, 0, 1, 1], [], []>} : vector<8x32xf32>, vector<32x128xf32>, vector<8x128xf32> -> vector<8x128xf32>
    %75 = arith.addf %73, %74 : vector<8x128xf32>
    %76 = vector.extract_strided_slice %75 {offsets = [0, 0], sizes = [8, 32], strides = [1, 1]} : vector<8x128xf32> to vector<8x32xf32>
    %77 = arith.negf %76 : vector<8x32xf32>
    %78 = math.exp %77 : vector<8x32xf32>
    %cst_22 = arith.constant 1.000000e+00 : f32
    %79 = vector.broadcast %cst_22 : f32 to vector<8x32xf32>
    %80 = arith.addf %79, %78 : vector<8x32xf32>
    %81 = arith.divf %79, %80 : vector<8x32xf32>
    %82 = vector.extract_strided_slice %75 {offsets = [0, 32], sizes = [8, 32], strides = [1, 1]} : vector<8x128xf32> to vector<8x32xf32>
    %83 = arith.negf %82 : vector<8x32xf32>
    %84 = math.exp %83 : vector<8x32xf32>
    %cst_23 = arith.constant 1.000000e+00 : f32
    %85 = vector.broadcast %cst_23 : f32 to vector<8x32xf32>
    %86 = arith.addf %85, %84 : vector<8x32xf32>
    %87 = arith.divf %85, %86 : vector<8x32xf32>
    %88 = vector.extract_strided_slice %75 {offsets = [0, 64], sizes = [8, 32], strides = [1, 1]} : vector<8x128xf32> to vector<8x32xf32>
    %89 = math.tanh %88 : vector<8x32xf32>
    %90 = vector.extract_strided_slice %75 {offsets = [0, 96], sizes = [8, 32], strides = [1, 1]} : vector<8x128xf32> to vector<8x32xf32>
    %91 = arith.negf %90 : vector<8x32xf32>
    %92 = math.exp %91 : vector<8x32xf32>
    %cst_24 = arith.constant 1.000000e+00 : f32
    %93 = vector.broadcast %cst_24 : f32 to vector<8x32xf32>
    %94 = arith.addf %93, %92 : vector<8x32xf32>
    %95 = arith.divf %93, %94 : vector<8x32xf32>
    %96 = arith.mulf %87, %69 : vector<8x32xf32>
    %97 = arith.mulf %81, %89 : vector<8x32xf32>
    %98 = arith.addf %96, %97 : vector<8x32xf32>
    %99 = math.tanh %98 : vector<8x32xf32>
    %100 = arith.mulf %95, %99 : vector<8x32xf32>
    %101 = vector.extract_strided_slice %10 {offsets = [3, 0, 0], sizes = [1, 8, 128], strides = [1, 1, 1]} : vector<8x8x128xf32> to vector<1x8x128xf32>
    %102 = vector.shape_cast %101 : vector<1x8x128xf32> to vector<8x128xf32>
    %cst_25 = arith.constant dense<0.000000e+00> : vector<8x128xf32>
    %103 = tpu.matmul %100, %11, %cst_25 {dimension_numbers = #tpu.dot_dimension_numbers<[1], [0], [0], [1], [0, 0, 1, 1], [], []>} : vector<8x32xf32>, vector<32x128xf32>, vector<8x128xf32> -> vector<8x128xf32>
    %104 = arith.addf %102, %103 : vector<8x128xf32>
    %105 = vector.extract_strided_slice %104 {offsets = [0, 0], sizes = [8, 32], strides = [1, 1]} : vector<8x128xf32> to vector<8x32xf32>
    %106 = arith.negf %105 : vector<8x32xf32>
    %107 = math.exp %106 : vector<8x32xf32>
    %cst_26 = arith.constant 1.000000e+00 : f32
    %108 = vector.broadcast %cst_26 : f32 to vector<8x32xf32>
    %109 = arith.addf %108, %107 : vector<8x32xf32>
    %110 = arith.divf %108, %109 : vector<8x32xf32>
    %111 = vector.extract_strided_slice %104 {offsets = [0, 32], sizes = [8, 32], strides = [1, 1]} : vector<8x128xf32> to vector<8x32xf32>
    %112 = arith.negf %111 : vector<8x32xf32>
    %113 = math.exp %112 : vector<8x32xf32>
    %cst_27 = arith.constant 1.000000e+00 : f32
    %114 = vector.broadcast %cst_27 : f32 to vector<8x32xf32>
    %115 = arith.addf %114, %113 : vector<8x32xf32>
    %116 = arith.divf %114, %115 : vector<8x32xf32>
    %117 = vector.extract_strided_slice %104 {offsets = [0, 64], sizes = [8, 32], strides = [1, 1]} : vector<8x128xf32> to vector<8x32xf32>
    %118 = math.tanh %117 : vector<8x32xf32>
    %119 = vector.extract_strided_slice %104 {offsets = [0, 96], sizes = [8, 32], strides = [1, 1]} : vector<8x128xf32> to vector<8x32xf32>
    %120 = arith.negf %119 : vector<8x32xf32>
    %121 = math.exp %120 : vector<8x32xf32>
    %cst_28 = arith.constant 1.000000e+00 : f32
    %122 = vector.broadcast %cst_28 : f32 to vector<8x32xf32>
    %123 = arith.addf %122, %121 : vector<8x32xf32>
    %124 = arith.divf %122, %123 : vector<8x32xf32>
    %125 = arith.mulf %116, %98 : vector<8x32xf32>
    %126 = arith.mulf %110, %118 : vector<8x32xf32>
    %127 = arith.addf %125, %126 : vector<8x32xf32>
    %128 = math.tanh %127 : vector<8x32xf32>
    %129 = arith.mulf %124, %128 : vector<8x32xf32>
    %130 = vector.extract_strided_slice %10 {offsets = [4, 0, 0], sizes = [1, 8, 128], strides = [1, 1, 1]} : vector<8x8x128xf32> to vector<1x8x128xf32>
    %131 = vector.shape_cast %130 : vector<1x8x128xf32> to vector<8x128xf32>
    %cst_29 = arith.constant dense<0.000000e+00> : vector<8x128xf32>
    %132 = tpu.matmul %129, %11, %cst_29 {dimension_numbers = #tpu.dot_dimension_numbers<[1], [0], [0], [1], [0, 0, 1, 1], [], []>} : vector<8x32xf32>, vector<32x128xf32>, vector<8x128xf32> -> vector<8x128xf32>
    %133 = arith.addf %131, %132 : vector<8x128xf32>
    %134 = vector.extract_strided_slice %133 {offsets = [0, 0], sizes = [8, 32], strides = [1, 1]} : vector<8x128xf32> to vector<8x32xf32>
    %135 = arith.negf %134 : vector<8x32xf32>
    %136 = math.exp %135 : vector<8x32xf32>
    %cst_30 = arith.constant 1.000000e+00 : f32
    %137 = vector.broadcast %cst_30 : f32 to vector<8x32xf32>
    %138 = arith.addf %137, %136 : vector<8x32xf32>
    %139 = arith.divf %137, %138 : vector<8x32xf32>
    %140 = vector.extract_strided_slice %133 {offsets = [0, 32], sizes = [8, 32], strides = [1, 1]} : vector<8x128xf32> to vector<8x32xf32>
    %141 = arith.negf %140 : vector<8x32xf32>
    %142 = math.exp %141 : vector<8x32xf32>
    %cst_31 = arith.constant 1.000000e+00 : f32
    %143 = vector.broadcast %cst_31 : f32 to vector<8x32xf32>
    %144 = arith.addf %143, %142 : vector<8x32xf32>
    %145 = arith.divf %143, %144 : vector<8x32xf32>
    %146 = vector.extract_strided_slice %133 {offsets = [0, 64], sizes = [8, 32], strides = [1, 1]} : vector<8x128xf32> to vector<8x32xf32>
    %147 = math.tanh %146 : vector<8x32xf32>
    %148 = vector.extract_strided_slice %133 {offsets = [0, 96], sizes = [8, 32], strides = [1, 1]} : vector<8x128xf32> to vector<8x32xf32>
    %149 = arith.negf %148 : vector<8x32xf32>
    %150 = math.exp %149 : vector<8x32xf32>
    %cst_32 = arith.constant 1.000000e+00 : f32
    %151 = vector.broadcast %cst_32 : f32 to vector<8x32xf32>
    %152 = arith.addf %151, %150 : vector<8x32xf32>
    %153 = arith.divf %151, %152 : vector<8x32xf32>
    %154 = arith.mulf %145, %127 : vector<8x32xf32>
    %155 = arith.mulf %139, %147 : vector<8x32xf32>
    %156 = arith.addf %154, %155 : vector<8x32xf32>
    %157 = math.tanh %156 : vector<8x32xf32>
    %158 = arith.mulf %153, %157 : vector<8x32xf32>
    %159 = vector.extract_strided_slice %10 {offsets = [5, 0, 0], sizes = [1, 8, 128], strides = [1, 1, 1]} : vector<8x8x128xf32> to vector<1x8x128xf32>
    %160 = vector.shape_cast %159 : vector<1x8x128xf32> to vector<8x128xf32>
    %cst_33 = arith.constant dense<0.000000e+00> : vector<8x128xf32>
    %161 = tpu.matmul %158, %11, %cst_33 {dimension_numbers = #tpu.dot_dimension_numbers<[1], [0], [0], [1], [0, 0, 1, 1], [], []>} : vector<8x32xf32>, vector<32x128xf32>, vector<8x128xf32> -> vector<8x128xf32>
    %162 = arith.addf %160, %161 : vector<8x128xf32>
    %163 = vector.extract_strided_slice %162 {offsets = [0, 0], sizes = [8, 32], strides = [1, 1]} : vector<8x128xf32> to vector<8x32xf32>
    %164 = arith.negf %163 : vector<8x32xf32>
    %165 = math.exp %164 : vector<8x32xf32>
    %cst_34 = arith.constant 1.000000e+00 : f32
    %166 = vector.broadcast %cst_34 : f32 to vector<8x32xf32>
    %167 = arith.addf %166, %165 : vector<8x32xf32>
    %168 = arith.divf %166, %167 : vector<8x32xf32>
    %169 = vector.extract_strided_slice %162 {offsets = [0, 32], sizes = [8, 32], strides = [1, 1]} : vector<8x128xf32> to vector<8x32xf32>
    %170 = arith.negf %169 : vector<8x32xf32>
    %171 = math.exp %170 : vector<8x32xf32>
    %cst_35 = arith.constant 1.000000e+00 : f32
    %172 = vector.broadcast %cst_35 : f32 to vector<8x32xf32>
    %173 = arith.addf %172, %171 : vector<8x32xf32>
    %174 = arith.divf %172, %173 : vector<8x32xf32>
    %175 = vector.extract_strided_slice %162 {offsets = [0, 64], sizes = [8, 32], strides = [1, 1]} : vector<8x128xf32> to vector<8x32xf32>
    %176 = math.tanh %175 : vector<8x32xf32>
    %177 = vector.extract_strided_slice %162 {offsets = [0, 96], sizes = [8, 32], strides = [1, 1]} : vector<8x128xf32> to vector<8x32xf32>
    %178 = arith.negf %177 : vector<8x32xf32>
    %179 = math.exp %178 : vector<8x32xf32>
    %cst_36 = arith.constant 1.000000e+00 : f32
    %180 = vector.broadcast %cst_36 : f32 to vector<8x32xf32>
    %181 = arith.addf %180, %179 : vector<8x32xf32>
    %182 = arith.divf %180, %181 : vector<8x32xf32>
    %183 = arith.mulf %174, %156 : vector<8x32xf32>
    %184 = arith.mulf %168, %176 : vector<8x32xf32>
    %185 = arith.addf %183, %184 : vector<8x32xf32>
    %186 = math.tanh %185 : vector<8x32xf32>
    %187 = arith.mulf %182, %186 : vector<8x32xf32>
    %188 = vector.extract_strided_slice %10 {offsets = [6, 0, 0], sizes = [1, 8, 128], strides = [1, 1, 1]} : vector<8x8x128xf32> to vector<1x8x128xf32>
    %189 = vector.shape_cast %188 : vector<1x8x128xf32> to vector<8x128xf32>
    %cst_37 = arith.constant dense<0.000000e+00> : vector<8x128xf32>
    %190 = tpu.matmul %187, %11, %cst_37 {dimension_numbers = #tpu.dot_dimension_numbers<[1], [0], [0], [1], [0, 0, 1, 1], [], []>} : vector<8x32xf32>, vector<32x128xf32>, vector<8x128xf32> -> vector<8x128xf32>
    %191 = arith.addf %189, %190 : vector<8x128xf32>
    %192 = vector.extract_strided_slice %191 {offsets = [0, 0], sizes = [8, 32], strides = [1, 1]} : vector<8x128xf32> to vector<8x32xf32>
    %193 = arith.negf %192 : vector<8x32xf32>
    %194 = math.exp %193 : vector<8x32xf32>
    %cst_38 = arith.constant 1.000000e+00 : f32
    %195 = vector.broadcast %cst_38 : f32 to vector<8x32xf32>
    %196 = arith.addf %195, %194 : vector<8x32xf32>
    %197 = arith.divf %195, %196 : vector<8x32xf32>
    %198 = vector.extract_strided_slice %191 {offsets = [0, 32], sizes = [8, 32], strides = [1, 1]} : vector<8x128xf32> to vector<8x32xf32>
    %199 = arith.negf %198 : vector<8x32xf32>
    %200 = math.exp %199 : vector<8x32xf32>
    %cst_39 = arith.constant 1.000000e+00 : f32
    %201 = vector.broadcast %cst_39 : f32 to vector<8x32xf32>
    %202 = arith.addf %201, %200 : vector<8x32xf32>
    %203 = arith.divf %201, %202 : vector<8x32xf32>
    %204 = vector.extract_strided_slice %191 {offsets = [0, 64], sizes = [8, 32], strides = [1, 1]} : vector<8x128xf32> to vector<8x32xf32>
    %205 = math.tanh %204 : vector<8x32xf32>
    %206 = vector.extract_strided_slice %191 {offsets = [0, 96], sizes = [8, 32], strides = [1, 1]} : vector<8x128xf32> to vector<8x32xf32>
    %207 = arith.negf %206 : vector<8x32xf32>
    %208 = math.exp %207 : vector<8x32xf32>
    %cst_40 = arith.constant 1.000000e+00 : f32
    %209 = vector.broadcast %cst_40 : f32 to vector<8x32xf32>
    %210 = arith.addf %209, %208 : vector<8x32xf32>
    %211 = arith.divf %209, %210 : vector<8x32xf32>
    %212 = arith.mulf %203, %185 : vector<8x32xf32>
    %213 = arith.mulf %197, %205 : vector<8x32xf32>
    %214 = arith.addf %212, %213 : vector<8x32xf32>
    %215 = math.tanh %214 : vector<8x32xf32>
    %216 = arith.mulf %211, %215 : vector<8x32xf32>
    %217 = vector.extract_strided_slice %10 {offsets = [7, 0, 0], sizes = [1, 8, 128], strides = [1, 1, 1]} : vector<8x8x128xf32> to vector<1x8x128xf32>
    %218 = vector.shape_cast %217 : vector<1x8x128xf32> to vector<8x128xf32>
    %cst_41 = arith.constant dense<0.000000e+00> : vector<8x128xf32>
    %219 = tpu.matmul %216, %11, %cst_41 {dimension_numbers = #tpu.dot_dimension_numbers<[1], [0], [0], [1], [0, 0, 1, 1], [], []>} : vector<8x32xf32>, vector<32x128xf32>, vector<8x128xf32> -> vector<8x128xf32>
    %220 = arith.addf %218, %219 : vector<8x128xf32>
    %221 = vector.extract_strided_slice %220 {offsets = [0, 0], sizes = [8, 32], strides = [1, 1]} : vector<8x128xf32> to vector<8x32xf32>
    %222 = arith.negf %221 : vector<8x32xf32>
    %223 = math.exp %222 : vector<8x32xf32>
    %cst_42 = arith.constant 1.000000e+00 : f32
    %224 = vector.broadcast %cst_42 : f32 to vector<8x32xf32>
    %225 = arith.addf %224, %223 : vector<8x32xf32>
    %226 = arith.divf %224, %225 : vector<8x32xf32>
    %227 = vector.extract_strided_slice %220 {offsets = [0, 32], sizes = [8, 32], strides = [1, 1]} : vector<8x128xf32> to vector<8x32xf32>
    %228 = arith.negf %227 : vector<8x32xf32>
    %229 = math.exp %228 : vector<8x32xf32>
    %cst_43 = arith.constant 1.000000e+00 : f32
    %230 = vector.broadcast %cst_43 : f32 to vector<8x32xf32>
    %231 = arith.addf %230, %229 : vector<8x32xf32>
    %232 = arith.divf %230, %231 : vector<8x32xf32>
    %233 = vector.extract_strided_slice %220 {offsets = [0, 64], sizes = [8, 32], strides = [1, 1]} : vector<8x128xf32> to vector<8x32xf32>
    %234 = math.tanh %233 : vector<8x32xf32>
    %235 = vector.extract_strided_slice %220 {offsets = [0, 96], sizes = [8, 32], strides = [1, 1]} : vector<8x128xf32> to vector<8x32xf32>
    %236 = arith.negf %235 : vector<8x32xf32>
    %237 = math.exp %236 : vector<8x32xf32>
    %cst_44 = arith.constant 1.000000e+00 : f32
    %238 = vector.broadcast %cst_44 : f32 to vector<8x32xf32>
    %239 = arith.addf %238, %237 : vector<8x32xf32>
    %240 = arith.divf %238, %239 : vector<8x32xf32>
    %241 = arith.mulf %232, %214 : vector<8x32xf32>
    %242 = arith.mulf %226, %234 : vector<8x32xf32>
    %243 = arith.addf %241, %242 : vector<8x32xf32>
    %244 = math.tanh %243 : vector<8x32xf32>
    %245 = arith.mulf %240, %244 : vector<8x32xf32>
    %c0_45 = arith.constant 0 : index
    %c0_46 = arith.constant 0 : index
    %246 = vector.load %arg6[%c0_45, %c0_46] : memref<8x32xf32, #tpu.memory_space<vmem>>, vector<8x32xf32>
    tpu.vector_store %arg6[%c0_45, %c0_46], %245 {strides = array<i32>} : memref<8x32xf32, #tpu.memory_space<vmem>>, vector<8x32xf32>,
    %c0_47 = arith.constant 0 : index
    %c0_48 = arith.constant 0 : index
    %247 = vector.load %arg7[%c0_47, %c0_48] : memref<8x32xf32, #tpu.memory_space<vmem>>, vector<8x32xf32>
    tpu.vector_store %arg7[%c0_47, %c0_48], %243 {strides = array<i32>} : memref<8x32xf32, #tpu.memory_space<vmem>>, vector<8x32xf32>,
    %248 = vector.shape_cast %42 : vector<8x32xf32> to vector<1x8x32xf32>
    %249 = vector.shape_cast %71 : vector<8x32xf32> to vector<1x8x32xf32>
    %250 = vector.shape_cast %100 : vector<8x32xf32> to vector<1x8x32xf32>
    %251 = vector.shape_cast %129 : vector<8x32xf32> to vector<1x8x32xf32>
    %252 = vector.shape_cast %158 : vector<8x32xf32> to vector<1x8x32xf32>
    %253 = vector.shape_cast %187 : vector<8x32xf32> to vector<1x8x32xf32>
    %254 = vector.shape_cast %216 : vector<8x32xf32> to vector<1x8x32xf32>
    %255 = vector.shape_cast %245 : vector<8x32xf32> to vector<1x8x32xf32>
    %256 = tpu.concatenate %248, %249, %250, %251, %252, %253, %254, %255 in 0 : vector<1x8x32xf32>, vector<1x8x32xf32>, vector<1x8x32xf32>, vector<1x8x32xf32>, vector<1x8x32xf32>, vector<1x8x32xf32>, vector<1x8x32xf32>, vector<1x8x32xf32> -> vector<8x8x32xf32>
    %257 = tpu.concatenate %3, %256 in 2 : vector<8x8x32xf32>, vector<8x8x32xf32> -> vector<8x8x64xf32>
    %c0_49 = arith.constant 0 : index
    %c0_50 = arith.constant 0 : index
    %c0_51 = arith.constant 0 : index
    %258 = vector.load %arg5[%c0_49, %c0_50, %c0_51] : memref<8x8x64xf32, #tpu.memory_space<vmem>>, vector<8x8x64xf32>
    tpu.vector_store %arg5[%c0_49, %c0_50, %c0_51], %257 {strides = array<i32>} : memref<8x8x64xf32, #tpu.memory_space<vmem>>, vector<8x8x64xf32>,
    return
  }
  func.func @transform_0(%arg0: i32) -> (i32, i32, i32) {
    %c0_i32 = arith.constant 0 : i32
    %c0_i32_0 = arith.constant 0 : i32
    %c0_i32_1 = arith.constant 0 : i32
    return %arg0, %c0_i32, %c0_i32_0 : i32, i32, i32
  }
  func.func @transform_1(%arg0: i32) -> (i32, i32) {
    %c0_i32 = arith.constant 0 : i32
    %c0_i32_0 = arith.constant 0 : i32
    %c0_i32_1 = arith.constant 0 : i32
    return %c0_i32, %c0_i32_0 : i32, i32
  }
  func.func @transform_2(%arg0: i32) -> (i32, i32) {
    %c0_i32 = arith.constant 0 : i32
    %c0_i32_0 = arith.constant 0 : i32
    %c0_i32_1 = arith.constant 0 : i32
    return %c0_i32, %c0_i32_0 : i32, i32
  }
  func.func @transform_3(%arg0: i32) -> (i32, i32) {
    %c0_i32 = arith.constant 0 : i32
    %c0_i32_0 = arith.constant 0 : i32
    %c0_i32_1 = arith.constant 0 : i32
    return %c0_i32, %c0_i32_0 : i32, i32
  }
  func.func @transform_4(%arg0: i32) -> (i32, i32, i32) {
    %c0_i32 = arith.constant 0 : i32
    %c0_i32_0 = arith.constant 0 : i32
    %c0_i32_1 = arith.constant 0 : i32
    return %arg0, %c0_i32, %c0_i32_0 : i32, i32, i32
  }
}

</mosaic_0001>

<bundles_post_ra>
// kernel: tpu_custom_call.1
= control target key start
LH: loop header
LB: loop body
LE: loop exit
PB: predicated region body
PF: predicated region fallthrough
CT: control target
= control target key end

     0   :  { %9 = vsyncpa [#allocation5], 0  ;;  %s1207_s0 = inlined_call_operand.hbm [shape: f32[8,8,32], index: 0, kind: input, shape index: {}]   ;;  %s1208_s1 = inlined_call_operand.hbm [shape: f32[32,128], index: 1, kind: input, shape index: {}]   ;;  %s1209_s2 = inlined_call_operand.hbm [shape: f32[32,128], index: 2, kind: input, shape index: {}]   ;;  %s1210_s3 = inlined_call_operand.vmem [shape: f32[1,128], index: 3, kind: input, shape index: {}]   ;;  %s1211_s4 = inlined_call_operand.hbm [shape: f32[8,8,64], index: 4, kind: output, shape index: {}]  }
   0x1   :  { %10 = vsyncpa [#allocation8], 0 }
   0x2   :  { %11 = vsyncpa [#allocation6], 0  ;;  %s29_s17 = sshll.u32 %s1208_s1, 4  ;;  %s950_s18 = smov [#allocation7]   ;;  %s30_s17 = int_to_ptr.hbm [resolvable:$true] %s29_s17 }
   0x3   :  { %s31_s19 = sshll.u32 %s950_s18, 4  ;;  %s16_s22 = sshll.u32 %s1207_s0, 4  ;;  %s32_s19 = int_to_ptr.vmem [resolvable:$true] %s31_s19  ;;  %s17_s22 = int_to_ptr.hbm [resolvable:$true] %s16_s22 }
   0x4   :  { %s951_s23 = smov 128   ;;  %s952_s24 = smov 8  }
   0x5   :  { %37 = dma.hbm_to_vmem [thread:$0]  %s30_s17, 512, %s32_s19, [#allocation8], %s951_s23, %s951_s23, %s952_s24  }
   0x6   :  { %s953_s25 = smov [#allocation4]   ;;  %s42_s1 = sshll.u32 %s1209_s2, 4  ;;  %s43_s1 = int_to_ptr.hbm [resolvable:$true] %s42_s1 }
   0x7   :  { %s18_s26 = sshll.u32 %s953_s25, 4  ;;  %s954_s0 = smov [#allocation9]   ;;  %s19_s26 = int_to_ptr.vmem [resolvable:$true] %s18_s26 }
   0x8   :  { %24 = dma.hbm_to_vmem [thread:$0]  %s17_s22, 1024, %s19_s26, [#allocation5], %s951_s23, %s951_s23, %s952_s24  }
   0x9   :  { %s44_s29 = sshll.u32 %s954_s0, 4  ;;  %s45_s29 = int_to_ptr.vmem [resolvable:$true] %s44_s29 }
   0xa   :  { %50 = dma.hbm_to_vmem [thread:$0]  %s43_s1, 512, %s45_s29, [#allocation8], %s951_s23, %s951_s23, %s952_s24  }
   0xb   :  { %944 = dma.done.wait [#allocation5], 1024  }
   0xc   :  { %945 = vsyncadd [#allocation5], 4294966272 }
   0xd   :  { %946 = dma.done.wait [#allocation8], 1024  }
   0xe   :  { %947 = vsyncadd [#allocation8], 4294966272  ;;  %vm69_vm0 = vcmask 261120   ;;  %v955_v0 = vmov 0.0   ;;  %v83_v1 = vld [vmem:[#allocation7 + $0x18] sm:$0xff]  ;;  %v82_v2 = vld [vmem:[#allocation7 + $0x10] sm:$0xff] }
   0xf   :  { %70 = vst.msk [vmem:[#allocation2] sm:$0xff] %vm69_vm0, %v955_v0  ;;  %761 = vmatpush.msra.mxu1 %v83_v1  ;;  %125 = vmatpush.msra.mxu0 %v83_v1  ;;  %v81_v3 = vld [vmem:[#allocation7 + $0x8] sm:$0xff]  ;;  %v80_v4 = vld [vmem:[#allocation7] sm:$0xff]  ;;  %v1009_v7 = vld [vmem:[#allocation9 + $0x18] sm:$0xff]  ;;  %s956_s5 = smov 64   ;;  %s957_s6 = smov 32  }
  0x10   :  { %71 = vst.msk [vmem:[#allocation3] sm:$0xff] %vm69_vm0, %v955_v0  ;;  %762 = vmatpush.msra.mxu2 %v83_v1  ;;  %763 = vmatpush.msra.mxu3 %v83_v1  ;;  %v1005_v5 = vld [vmem:[#allocation4 + $0x20] sm:$0xff]  ;;  %v1013_v8 = vld [vmem:[#allocation9 + $0x10] sm:$0xff]  ;;  %v1018_v9 = vld [vmem:[#allocation9 + $0x8] sm:$0xff]  ;;  %s959_s7 = smov [#allocation10]   ;;  %s723_s11 = sshll.u32 %s1211_s4, 4  ;;  %s724_s11 = int_to_ptr.hbm [resolvable:$true] %s723_s11 }
  0x11   :  { %764 = vmatpush.msra.mxu1 %v82_v2  ;;  %126 = vmatpush.msra.mxu0 %v82_v2  ;;  %v1007_v6 = vld [vmem:[#allocation4] sm:$0xff]  ;;  %v1047_v14 = vld [vmem:[%s1210_s3] ss:$0 sm:$0xff]  ;;  %v1054_v40 = vld [vmem:[#allocation4 + $0x28] sm:$0xff]  ;;  %s958_s3 = smov 96   ;;  %s721_s8 = sshll.u32 %s959_s7, 4  ;;  %s722_s8 = int_to_ptr.vmem [resolvable:$true] %s721_s8 }
  0x12   :  { %765 = vmatpush.msra.mxu2 %v82_v2  ;;  %766 = vmatpush.msra.mxu3 %v82_v2  ;;  %v1023_v10 = vld [vmem:[#allocation9] sm:$0xff]  ;;  %v1066_v43 = vld [vmem:[#allocation4 + $0x8] sm:$0xff] }
  0x13   :  { %767 = vmatpush.msra.mxu1 %v81_v3  ;;  %127 = vmatpush.msra.mxu0 %v81_v3 }
  0x14   :  { %768 = vmatpush.msra.mxu2 %v81_v3  ;;  %769 = vmatpush.msra.mxu3 %v81_v3 }
  0x15   :  { %770 = vmatpush.msra.mxu1 %v80_v4  ;;  %128 = vmatpush.msra.mxu0 %v80_v4 }
  0x16   :  { %741 = vmatmul.msk.f32.vlgmr.msra.gmra.mxu1 %vm69_vm0, %v1005_v5  ;;  %737 = vmatmul.msk.f32.vlgmr.msra.gmra.mxu0 %vm69_vm0, %v1007_v6  ;;  %v158_v11 = vld [vmem:[#allocation2] sm:$0xff] }
  0x17   :  { %175 = vmatpush.msrb.mxu1 %v1009_v7  ;;  %771 = vmatpush.msra.mxu2 %v80_v4  ;;  %v159_v19 = vld [vmem:[#allocation3] sm:$0xff] }
  0x18   :  { %772 = vmatpush.msra.mxu3 %v80_v4  ;;  %742 = vmatmul.msk.f32.vlgmr.msra.gmra.mxu2 %vm69_vm0, %v1054_v40 }
  0x19   :  { %242 = vmatpush.msrb.mxu2 %v1009_v7  ;;  %176 = vmatpush.msrb.mxu1 %v1013_v8 }
  0x1a   :  { %305 = vmatpush.msrb.mxu3 %v1009_v7 }
  0x1b   :  { %243 = vmatpush.msrb.mxu2 %v1013_v8  ;;  %177 = vmatpush.msrb.mxu1 %v1018_v9 }
  0x1c   :  { %306 = vmatpush.msrb.mxu3 %v1013_v8 }
  0x1d   :  { %244 = vmatpush.msrb.mxu2 %v1018_v9  ;;  %178 = vmatpush.msrb.mxu1 %v1023_v10 }
  0x1e   :  { %307 = vmatpush.msrb.mxu3 %v1018_v9  ;;  %745 = vmatmul.msk.f32.vlgmr.msrb.gmra.mxu1 %vm69_vm0, %v158_v11 }
  0x1f   :  { %245 = vmatpush.msrb.mxu2 %v1023_v10  ;;  %368 = vmatpush.msra.mxu1 %v1009_v7 }
  0x20   :  { %308 = vmatpush.msrb.mxu3 %v1023_v10  ;;  %738 = vmatmul.msk.f32.gmra.mxu0 %vm69_vm0, %v1066_v43 }
  0x21   :  { %369 = vmatpush.msra.mxu1 %v1013_v8  ;;  %431 = vmatpush.msra.mxu2 %v1009_v7 }
  0x23   :  { %370 = vmatpush.msra.mxu1 %v1018_v9  ;;  %432 = vmatpush.msra.mxu2 %v1013_v8 }
  0x25   :  { %371 = vmatpush.msra.mxu1 %v1023_v10  ;;  %433 = vmatpush.msra.mxu2 %v1018_v9 }
  0x27   :  { %557 = vmatpush.msrb.mxu1 %v1009_v7  ;;  %434 = vmatpush.msra.mxu2 %v1023_v10 }
  0x29   :  { %558 = vmatpush.msrb.mxu1 %v1013_v8 }
  0x2b   :  { %559 = vmatpush.msrb.mxu1 %v1018_v9 }
  0x2d   :  { %560 = vmatpush.msrb.mxu1 %v1023_v10 }
  0x93   :  { %v1042_v12 = vpop.f32.mrf.mxu1  ;;  %v130_v13 = vpop.f32.mrf.mxu0 }
  0x94   :  { %v131_v15 = vadd.f32 %v1047_v14, %v130_v13  ;;  %v1081_v13 = vld [vmem:[#allocation4 + $0x30] sm:$0xff] }
  0x95   :  { %743 = vmatmul.msk.f32.vlgmr.msra.gmra.mxu3 %vm69_vm0, %v1081_v13 }
  0x96   :  { %494 = vmatpush.msra.mxu3 %v1009_v7 }
  0x98   :  { %495 = vmatpush.msra.mxu3 %v1013_v8 }
  0x9a   :  { %496 = vmatpush.msra.mxu3 %v1018_v9 }
  0x9b   :  { %v180_v16 = vpop.f32.mrf.mxu1  ;;  %v1075_v45 = vpop.f32.mrf.mxu2 }
  0x9c   :  { %v183_v17 = vadd.f32 %v180_v16, %v131_v15  ;;  %v1087_v15 = vld [vmem:[#allocation4 + $0x38] sm:$0xff]  ;;  %497 = vmatpush.msra.mxu3 %v1023_v10 }
  0x9d   :  { %v133_v46 = vpop.f32.mrf.mxu0  ;;  %744 = vmatmul.msk.f32.gmra.mxu3 %vm69_vm0, %v1087_v15 }
  0x9e   :  { %784 = vtanh.f32 %v183_v17  ;;  %v746_v20 = vmul.f32 -1.442695, %v183_v17  ;;  %v134_v47 = vadd.f32 %v1047_v14, %v133_v46  ;;  %v1110_v46 = vld [vmem:[#allocation4 + $0x18] sm:$0xff] }
  0xa0   :  { %786 = vpow2.f32 %v746_v20 }
  0xa4   :  { %v785_v18 = vpop.eup %784 }
  0xa5   :  { %210 = vrot.lane.b32.xlu0 %v785_v18, %s956_s5  ;;  %v1097_v18 = vld [vmem:[#allocation4 + $0x10] sm:$0xff] }
  0xa6   :  { %v787_v21 = vpop.eup %786  ;;  %739 = vmatmul.msk.f32.gmra.mxu0 %vm69_vm0, %v1097_v18 }
  0xa7   :  { %v187_v22 = vadd.f32 1.0, %v787_v21 }
  0xa9   :  { %788 = vrcp.f32 %v187_v22  ;;  %v199_v28 = vand.u32 2147483648, %v187_v22  ;;  %vm193_vm2 = vweird.f32 %v187_v22  ;;  %v197_v29 = vand.u32 2147483647, %v187_v22 }
  0xab   :  { %v200_v31 = vor.u32 1.1754944e-38, %v199_v28  ;;  %vm198_vm4 = vcmp.eq.f32.partialorder %v197_v29, 8.507059e+37 }
  0xad   :  { %205 = vrot.lane.b32.xlu0 %v159_v19, %s957_s6 }
  0xae   :  { %740 = vmatmul.msk.f32.gmra.mxu0 %vm69_vm0, %v1110_v46 }
  0xaf   :  { %v789_v23 = vpop.eup %788 }
  0xb0   :  { %v189_v24 = vmul.f32 %v789_v23, %v187_v22  ;;  %vm194_vm1 = vweird.f32 %v789_v23 }
  0xb1   :  { %vm195_vm3 = vmor %vm193_vm2, %vm194_vm1 }
  0xb2   :  { %v190_v25 = vsub.f32 1.0, %v189_v24 }
  0xb4   :  { %v191_v26 = vmul.f32 %v789_v23, %v190_v25 }
  0xb6   :  { %v192_v27 = vadd.f32 %v789_v23, %v191_v26 }
  0xb8   :  { %v196_v30 = vsel %vm195_vm3, %v789_v23, %v192_v27 }
  0xb9   :  { %v201_v33 = vsel %vm198_vm4, %v200_v31, %v196_v30 }
 0x117   :  { %v211_v32 = vpop.permute.xlu0 %210 }
 0x118   :  { %v213_v34 = vmul.f32 %v211_v32, %v201_v33 }
 0x11a   :  { %215 = vrot.lane.b32.xlu1 %v213_v34, %s957_s6 }
 0x11f   :  { %v206_v35 = vpop.permute.xlu0 %205 }
 0x120   :  { %v208_v36 = vmul.f32 %v206_v35, %v201_v33 }
 0x18c   :  { %v216_v37 = vpop.permute.xlu1 %215 }
 0x18d   :  { %v218_v38 = vadd.f32 %v216_v37, %v208_v36 }
 0x18f   :  { %790 = vtanh.f32 %v218_v38 }
 0x195   :  { %v791_v39 = vpop.eup %790 }
 0x196   :  { %221 = vrot.lane.b32.xlu1 %v791_v39, %s956_s5 }
 0x208   :  { %v222_v41 = vpop.permute.xlu1 %221 }
 0x209   :  { %v1062_v42 = vmul.f32 %v222_v41, %v201_v33 }
 0x20b   :  { %226 = vrot.lane.b32.xlu2 %v1062_v42, %s957_s6 }
 0x265   :  { %v227_v44 = vpop.permute.xlu2 %226 }
 0x266   :  { %747 = vmatmul.msk.f32.vlgmr.msrb.gmra.mxu2 %vm69_vm0, %v227_v44 }
 0x267   :  { %620 = vmatpush.msrb.mxu2 %v1009_v7 }
 0x269   :  { %621 = vmatpush.msrb.mxu2 %v1013_v8  ;;  %v1102_v8 = vpop.f32.mrf.mxu3 }
 0x26b   :  { %622 = vmatpush.msrb.mxu2 %v1018_v9 }
 0x26d   :  { %623 = vmatpush.msrb.mxu2 %v1023_v10  ;;  %v136_v10 = vpop.f32.mrf.mxu0 }
 0x26e   :  { %v137_v19 = vadd.f32 %v1047_v14, %v136_v10 }
 0x271   :  { %v1104_v9 = vpop.f32.mrf.mxu3 }
 0x2e9   :  { %v247_v48 = vpop.f32.mrf.mxu2 }
 0x2ea   :  { %v250_v49 = vadd.f32 %v247_v48, %v134_v47 }
 0x2ec   :  { %792 = vtanh.f32 %v250_v49  ;;  %v748_v51 = vmul.f32 -1.442695, %v250_v49 }
 0x2ee   :  { %794 = vpow2.f32 %v748_v51 }
 0x2f2   :  { %v793_v50 = vpop.eup %792 }
 0x2f3   :  { %273 = vrot.lane.b32.xlu2 %v793_v50, %s956_s5  ;;  %v139_v50 = vpop.f32.mrf.mxu0 }
 0x2f4   :  { %v795_v52 = vpop.eup %794  ;;  %v140_v51 = vadd.f32 %v1047_v14, %v139_v50 }
 0x2f5   :  { %v254_v53 = vadd.f32 1.0, %v795_v52 }
 0x2f7   :  { %796 = vrcp.f32 %v254_v53  ;;  %v266_v59 = vand.u32 2147483648, %v254_v53  ;;  %vm260_vm6 = vweird.f32 %v254_v53  ;;  %v264_v60 = vand.u32 2147483647, %v254_v53 }
 0x2f9   :  { %v267_v62 = vor.u32 1.1754944e-38, %v266_v59  ;;  %vm265_vm8 = vcmp.eq.f32.partialorder %v264_v60, 8.507059e+37 }
 0x2fd   :  { %v797_v54 = vpop.eup %796 }
 0x2fe   :  { %v256_v55 = vmul.f32 %v797_v54, %v254_v53  ;;  %vm261_vm5 = vweird.f32 %v797_v54 }
 0x2ff   :  { %vm262_vm7 = vmor %vm260_vm6, %vm261_vm5 }
 0x300   :  { %v257_v56 = vsub.f32 1.0, %v256_v55 }
 0x302   :  { %v258_v57 = vmul.f32 %v797_v54, %v257_v56 }
 0x304   :  { %v259_v58 = vadd.f32 %v797_v54, %v258_v57 }
 0x306   :  { %v263_v61 = vsel %vm262_vm7, %v797_v54, %v259_v58 }
 0x307   :  { %v268_v0 = vsel %vm265_vm8, %v267_v62, %v263_v61 }
 0x308   :  { %v271_v2 = vmul.f32 %v268_v0, %v218_v38 }
 0x34d   :  { %v274_v63 = vpop.permute.xlu2 %273 }
 0x34e   :  { %v276_v1 = vmul.f32 %v274_v63, %v268_v0 }
 0x350   :  { %278 = vrot.lane.b32.xlu0 %v276_v1, %s957_s6 }
 0x3c2   :  { %v279_v3 = vpop.permute.xlu0 %278 }
 0x3c3   :  { %v281_v4 = vadd.f32 %v279_v3, %v271_v2 }
 0x3c5   :  { %798 = vtanh.f32 %v281_v4 }
 0x3cb   :  { %v799_v11 = vpop.eup %798 }
 0x3cc   :  { %284 = vrot.lane.b32.xlu1 %v799_v11, %s956_s5 }
 0x43e   :  { %v285_v16 = vpop.permute.xlu1 %284 }
 0x43f   :  { %v1093_v17 = vmul.f32 %v285_v16, %v268_v0 }
 0x441   :  { %289 = vrot.lane.b32.xlu2 %v1093_v17, %s957_s6 }
 0x49b   :  { %v290_v7 = vpop.permute.xlu2 %289 }
 0x49c   :  { %749 = vmatmul.msk.f32.vlgmr.msrb.gmra.mxu3 %vm69_vm0, %v290_v7 }
 0x51f   :  { %v310_v20 = vpop.f32.mrf.mxu3 }
 0x520   :  { %v313_v21 = vadd.f32 %v310_v20, %v137_v19 }
 0x522   :  { %800 = vtanh.f32 %v313_v21  ;;  %v750_v23 = vmul.f32 -1.442695, %v313_v21 }
 0x524   :  { %802 = vpow2.f32 %v750_v23  ;;  %v143_v23 = vadd.f32 %v1047_v14, %v1042_v12 }
 0x528   :  { %v801_v22 = vpop.eup %800 }
 0x529   :  { %336 = vrot.lane.b32.xlu0 %v801_v22, %s956_s5 }
 0x52a   :  { %v803_v24 = vpop.eup %802 }
 0x52b   :  { %v317_v25 = vadd.f32 1.0, %v803_v24 }
 0x52d   :  { %804 = vrcp.f32 %v317_v25  ;;  %v329_v31 = vand.u32 2147483648, %v317_v25  ;;  %vm323_vm10 = vweird.f32 %v317_v25  ;;  %v327_v32 = vand.u32 2147483647, %v317_v25 }
 0x52f   :  { %v330_v34 = vor.u32 1.1754944e-38, %v329_v31  ;;  %vm328_vm12 = vcmp.eq.f32.partialorder %v327_v32, 8.507059e+37 }
 0x533   :  { %v805_v26 = vpop.eup %804 }
 0x534   :  { %v319_v27 = vmul.f32 %v805_v26, %v317_v25  ;;  %vm324_vm9 = vweird.f32 %v805_v26 }
 0x535   :  { %vm325_vm11 = vmor %vm323_vm10, %vm324_vm9 }
 0x536   :  { %v320_v28 = vsub.f32 1.0, %v319_v27 }
 0x538   :  { %v321_v29 = vmul.f32 %v805_v26, %v320_v28 }
 0x53a   :  { %v322_v30 = vadd.f32 %v805_v26, %v321_v29 }
 0x53c   :  { %v326_v33 = vsel %vm325_vm11, %v805_v26, %v322_v30 }
 0x53d   :  { %v331_v36 = vsel %vm328_vm12, %v330_v34, %v326_v33 }
 0x53e   :  { %v334_v38 = vmul.f32 %v331_v36, %v281_v4 }
 0x59b   :  { %v337_v35 = vpop.permute.xlu0 %336 }
 0x59c   :  { %v339_v37 = vmul.f32 %v337_v35, %v331_v36 }
 0x59e   :  { %341 = vrot.lane.b32.xlu1 %v339_v37, %s957_s6 }
 0x610   :  { %v342_v39 = vpop.permute.xlu1 %341 }
 0x611   :  { %v344_v41 = vadd.f32 %v342_v39, %v334_v38 }
 0x613   :  { %806 = vtanh.f32 %v344_v41 }
 0x619   :  { %v807_v44 = vpop.eup %806 }
 0x61a   :  { %347 = vrot.lane.b32.xlu2 %v807_v44, %s956_s5 }
 0x674   :  { %v348_v47 = vpop.permute.xlu2 %347 }
 0x675   :  { %v1114_v48 = vmul.f32 %v348_v47, %v331_v36 }
 0x677   :  { %352 = vrot.lane.b32.xlu0 %v1114_v48, %s957_s6 }
 0x6e9   :  { %v353_v49 = vpop.permute.xlu0 %352 }
 0x6ea   :  { %751 = vmatmul.msk.f32.vlgmr.msra.gmra.mxu1 %vm69_vm0, %v353_v49 }
 0x767   :  { %v373_v52 = vpop.f32.mrf.mxu1 }
 0x768   :  { %v376_v53 = vadd.f32 %v373_v52, %v140_v51 }
 0x76a   :  { %808 = vtanh.f32 %v376_v53  ;;  %v752_v55 = vmul.f32 -1.442695, %v376_v53 }
 0x76c   :  { %810 = vpow2.f32 %v752_v55 }
 0x770   :  { %v809_v54 = vpop.eup %808 }
 0x771   :  { %399 = vrot.lane.b32.xlu1 %v809_v54, %s956_s5  ;;  %v146_v54 = vadd.f32 %v1047_v14, %v1075_v45 }
 0x772   :  { %v811_v56 = vpop.eup %810 }
 0x773   :  { %v380_v57 = vadd.f32 1.0, %v811_v56 }
 0x775   :  { %812 = vrcp.f32 %v380_v57  ;;  %v392_v63 = vand.u32 2147483648, %v380_v57  ;;  %vm386_vm14 = vweird.f32 %v380_v57  ;;  %v390_v0 = vand.u32 2147483647, %v380_v57 }
 0x777   :  { %v393_v2 = vor.u32 1.1754944e-38, %v392_v63  ;;  %vm391_vm1 = vcmp.eq.f32.partialorder %v390_v0, 8.507059e+37 }
 0x77b   :  { %v813_v58 = vpop.eup %812 }
 0x77c   :  { %v382_v59 = vmul.f32 %v813_v58, %v380_v57  ;;  %vm387_vm13 = vweird.f32 %v813_v58 }
 0x77d   :  { %vm388_vm15 = vmor %vm386_vm14, %vm387_vm13 }
 0x77e   :  { %v383_v60 = vsub.f32 1.0, %v382_v59 }
 0x780   :  { %v384_v61 = vmul.f32 %v813_v58, %v383_v60 }
 0x782   :  { %v385_v62 = vadd.f32 %v813_v58, %v384_v61 }
 0x784   :  { %v389_v1 = vsel %vm388_vm15, %v813_v58, %v385_v62 }
 0x785   :  { %v394_v4 = vsel %vm391_vm1, %v393_v2, %v389_v1 }
 0x786   :  { %v397_v16 = vmul.f32 %v394_v4, %v344_v41 }
 0x7e3   :  { %v400_v3 = vpop.permute.xlu1 %399 }
 0x7e4   :  { %v402_v11 = vmul.f32 %v400_v3, %v394_v4 }
 0x7e6   :  { %404 = vrot.lane.b32.xlu2 %v402_v11, %s957_s6 }
 0x840   :  { %v405_v7 = vpop.permute.xlu2 %404 }
 0x841   :  { %v407_v10 = vadd.f32 %v405_v7, %v397_v16 }
 0x843   :  { %814 = vtanh.f32 %v407_v10 }
 0x849   :  { %v815_v19 = vpop.eup %814 }
 0x84a   :  { %410 = vrot.lane.b32.xlu0 %v815_v19, %s956_s5 }
 0x8bc   :  { %v411_v20 = vpop.permute.xlu0 %410 }
 0x8bd   :  { %v1123_v21 = vmul.f32 %v411_v20, %v394_v4 }
 0x8bf   :  { %415 = vrot.lane.b32.xlu1 %v1123_v21, %s957_s6 }
 0x931   :  { %v416_v22 = vpop.permute.xlu1 %415 }
 0x932   :  { %753 = vmatmul.msk.f32.vlgmr.msra.gmra.mxu2 %vm69_vm0, %v416_v22 }
 0x9b5   :  { %v436_v24 = vpop.f32.mrf.mxu2 }
 0x9b6   :  { %v439_v25 = vadd.f32 %v436_v24, %v143_v23 }
 0x9b8   :  { %816 = vtanh.f32 %v439_v25  ;;  %v754_v27 = vmul.f32 -1.442695, %v439_v25 }
 0x9ba   :  { %818 = vpow2.f32 %v754_v27 }
 0x9be   :  { %v817_v26 = vpop.eup %816 }
 0x9bf   :  { %462 = vrot.lane.b32.xlu2 %v817_v26, %s956_s5  ;;  %v149_v26 = vadd.f32 %v1047_v14, %v1102_v8 }
 0x9c0   :  { %v819_v28 = vpop.eup %818 }
 0x9c1   :  { %v443_v29 = vadd.f32 1.0, %v819_v28 }
 0x9c3   :  { %820 = vrcp.f32 %v443_v29  ;;  %v455_v35 = vand.u32 2147483648, %v443_v29  ;;  %vm449_vm3 = vweird.f32 %v443_v29  ;;  %v453_v12 = vand.u32 2147483647, %v443_v29 }
 0x9c5   :  { %v456_v37 = vor.u32 1.1754944e-38, %v455_v35  ;;  %vm454_vm5 = vcmp.eq.f32.partialorder %v453_v12, 8.507059e+37 }
 0x9c9   :  { %v821_v30 = vpop.eup %820 }
 0x9ca   :  { %v445_v31 = vmul.f32 %v821_v30, %v443_v29  ;;  %vm450_vm2 = vweird.f32 %v821_v30 }
 0x9cb   :  { %vm451_vm4 = vmor %vm449_vm3, %vm450_vm2  ;;  %vm708_vm3 = vcmask 523264  }
 0x9cc   :  { %v446_v32 = vsub.f32 1.0, %v445_v31 }
 0x9ce   :  { %v447_v33 = vmul.f32 %v821_v30, %v446_v32 }
 0x9d0   :  { %v448_v34 = vadd.f32 %v821_v30, %v447_v33 }
 0x9d2   :  { %v452_v36 = vsel %vm451_vm4, %v821_v30, %v448_v34 }
 0x9d3   :  { %v457_v39 = vsel %vm454_vm5, %v456_v37, %v452_v36 }
 0x9d4   :  { %v460_v44 = vmul.f32 %v457_v39, %v407_v10 }
 0xa19   :  { %v463_v38 = vpop.permute.xlu2 %462 }
 0xa1a   :  { %v465_v41 = vmul.f32 %v463_v38, %v457_v39 }
 0xa1c   :  { %467 = vrot.lane.b32.xlu0 %v465_v41, %s957_s6 }
 0xa8e   :  { %v468_v47 = vpop.permute.xlu0 %467 }
 0xa8f   :  { %v470_v49 = vadd.f32 %v468_v47, %v460_v44 }
 0xa91   :  { %822 = vtanh.f32 %v470_v49 }
 0xa97   :  { %v823_v50 = vpop.eup %822 }
 0xa98   :  { %473 = vrot.lane.b32.xlu1 %v823_v50, %s956_s5 }
 0xb0a   :  { %v474_v51 = vpop.permute.xlu1 %473 }
 0xb0b   :  { %v1133_v52 = vmul.f32 %v474_v51, %v457_v39 }
 0xb0d   :  { %478 = vrot.lane.b32.xlu2 %v1133_v52, %s957_s6 }
 0xb67   :  { %v479_v53 = vpop.permute.xlu2 %478 }
 0xb68   :  { %755 = vmatmul.msk.f32.vlgmr.msra.gmra.mxu3 %vm69_vm0, %v479_v53 }
 0xbeb   :  { %v499_v55 = vpop.f32.mrf.mxu3 }
 0xbec   :  { %v502_v56 = vadd.f32 %v499_v55, %v146_v54 }
 0xbee   :  { %824 = vtanh.f32 %v502_v56  ;;  %v756_v58 = vmul.f32 -1.442695, %v502_v56 }
 0xbf0   :  { %826 = vpow2.f32 %v756_v58 }
 0xbf4   :  { %v825_v57 = vpop.eup %824 }
 0xbf5   :  { %525 = vrot.lane.b32.xlu0 %v825_v57, %s956_s5  ;;  %v152_v57 = vadd.f32 %v1047_v14, %v1104_v9 }
 0xbf6   :  { %v827_v59 = vpop.eup %826 }
 0xbf7   :  { %v506_v60 = vadd.f32 1.0, %v827_v59 }
 0xbf9   :  { %828 = vrcp.f32 %v506_v60  ;;  %v518_v2 = vand.u32 2147483648, %v506_v60  ;;  %vm512_vm7 = vweird.f32 %v506_v60  ;;  %v516_v45 = vand.u32 2147483647, %v506_v60 }
 0xbfb   :  { %v519_v4 = vor.u32 1.1754944e-38, %v518_v2  ;;  %vm517_vm9 = vcmp.eq.f32.partialorder %v516_v45, 8.507059e+37 }
 0xbff   :  { %v829_v61 = vpop.eup %828 }
 0xc00   :  { %v508_v62 = vmul.f32 %v829_v61, %v506_v60  ;;  %vm513_vm6 = vweird.f32 %v829_v61 }
 0xc01   :  { %vm514_vm8 = vmor %vm512_vm7, %vm513_vm6 }
 0xc02   :  { %v509_v63 = vsub.f32 1.0, %v508_v62 }
 0xc04   :  { %v510_v0 = vmul.f32 %v829_v61, %v509_v63 }
 0xc06   :  { %v511_v1 = vadd.f32 %v829_v61, %v510_v0 }
 0xc08   :  { %v515_v3 = vsel %vm514_vm8, %v829_v61, %v511_v1 }
 0xc09   :  { %v520_v16 = vsel %vm517_vm9, %v519_v4, %v515_v3 }
 0xc0a   :  { %v523_v10 = vmul.f32 %v520_v16, %v470_v49 }
 0xc67   :  { %v526_v11 = vpop.permute.xlu0 %525 }
 0xc68   :  { %v528_v7 = vmul.f32 %v526_v11, %v520_v16 }
 0xc6a   :  { %530 = vrot.lane.b32.xlu1 %v528_v7, %s957_s6 }
 0xcdc   :  { %v531_v19 = vpop.permute.xlu1 %530 }
 0xcdd   :  { %v533_v20 = vadd.f32 %v531_v19, %v523_v10 }
 0xcdf   :  { %830 = vtanh.f32 %v533_v20 }
 0xce5   :  { %v831_v22 = vpop.eup %830 }
 0xce6   :  { %536 = vrot.lane.b32.xlu2 %v831_v22, %s956_s5 }
 0xd40   :  { %v537_v23 = vpop.permute.xlu2 %536 }
 0xd41   :  { %v1143_v24 = vmul.f32 %v537_v23, %v520_v16 }
 0xd43   :  { %541 = vrot.lane.b32.xlu0 %v1143_v24, %s957_s6 }
 0xdb5   :  { %v542_v25 = vpop.permute.xlu0 %541 }
 0xdb6   :  { %757 = vmatmul.msk.f32.vlgmr.msrb.gmra.mxu1 %vm69_vm0, %v542_v25 }
 0xe33   :  { %v562_v27 = vpop.f32.mrf.mxu1 }
 0xe34   :  { %v565_v28 = vadd.f32 %v562_v27, %v149_v26 }
 0xe36   :  { %832 = vtanh.f32 %v565_v28  ;;  %v758_v30 = vmul.f32 -1.442695, %v565_v28 }
 0xe38   :  { %834 = vpow2.f32 %v758_v30 }
 0xe3c   :  { %v833_v29 = vpop.eup %832 }
 0xe3d   :  { %588 = vrot.lane.b32.xlu1 %v833_v29, %s956_s5 }
 0xe3e   :  { %v835_v31 = vpop.eup %834 }
 0xe3f   :  { %v569_v32 = vadd.f32 1.0, %v835_v31 }
 0xe41   :  { %836 = vrcp.f32 %v569_v32  ;;  %v581_v37 = vand.u32 2147483648, %v569_v32  ;;  %vm575_vm11 = vweird.f32 %v569_v32  ;;  %v579_v8 = vand.u32 2147483647, %v569_v32 }
 0xe43   :  { %v582_v39 = vor.u32 1.1754944e-38, %v581_v37  ;;  %vm580_vm13 = vcmp.eq.f32.partialorder %v579_v8, 8.507059e+37 }
 0xe47   :  { %v837_v33 = vpop.eup %836 }
 0xe48   :  { %v571_v34 = vmul.f32 %v837_v33, %v569_v32  ;;  %vm576_vm10 = vweird.f32 %v837_v33 }
 0xe49   :  { %vm577_vm12 = vmor %vm575_vm11, %vm576_vm10 }
 0xe4a   :  { %v572_v35 = vsub.f32 1.0, %v571_v34 }
 0xe4c   :  { %v573_v12 = vmul.f32 %v837_v33, %v572_v35 }
 0xe4e   :  { %v574_v36 = vadd.f32 %v837_v33, %v573_v12 }
 0xe50   :  { %v578_v38 = vsel %vm577_vm12, %v837_v33, %v574_v36 }
 0xe51   :  { %v583_v44 = vsel %vm580_vm13, %v582_v39, %v578_v38 }
 0xe52   :  { %v586_v49 = vmul.f32 %v583_v44, %v533_v20 }
 0xeaf   :  { %v589_v41 = vpop.permute.xlu1 %588 }
 0xeb0   :  { %v591_v47 = vmul.f32 %v589_v41, %v583_v44 }
 0xeb2   :  { %593 = vrot.lane.b32.xlu2 %v591_v47, %s957_s6 }
 0xf0c   :  { %v594_v50 = vpop.permute.xlu2 %593 }
 0xf0d   :  { %v596_v51 = vadd.f32 %v594_v50, %v586_v49 }
 0xf0f   :  { %838 = vtanh.f32 %v596_v51 }
 0xf15   :  { %v839_v53 = vpop.eup %838 }
 0xf16   :  { %599 = vrot.lane.b32.xlu0 %v839_v53, %s956_s5 }
 0xf88   :  { %v600_v54 = vpop.permute.xlu0 %599 }
 0xf89   :  { %v602_v55 = vmul.f32 %v600_v54, %v583_v44 }
 0xf8b   :  { %604 = vrot.lane.b32.xlu1 %v602_v55, %s957_s6 }
 0xffd   :  { %v605_v56 = vpop.permute.xlu1 %604 }
 0xffe   :  { %759 = vmatmul.msk.f32.vlgmr.msrb.gmra.mxu2 %vm69_vm0, %v605_v56 }
0x1081   :  { %v625_v58 = vpop.f32.mrf.mxu2 }
0x1082   :  { %v628_v59 = vadd.f32 %v625_v58, %v152_v57 }
0x1084   :  { %840 = vtanh.f32 %v628_v59  ;;  %v760_v61 = vmul.f32 -1.442695, %v628_v59 }
0x1086   :  { %842 = vpow2.f32 %v760_v61 }
0x108a   :  { %v841_v60 = vpop.eup %840 }
0x108b   :  { %651 = vrot.lane.b32.xlu2 %v841_v60, %s956_s5 }
0x108c   :  { %v843_v62 = vpop.eup %842 }
0x108d   :  { %v632_v63 = vadd.f32 1.0, %v843_v62 }
0x108f   :  { %844 = vrcp.f32 %v632_v63  ;;  %v644_v45 = vand.u32 2147483648, %v632_v63  ;;  %vm638_vm15 = vweird.f32 %v632_v63  ;;  %v642_v3 = vand.u32 2147483647, %v632_v63 }
0x1091   :  { %v645_v4 = vor.u32 1.1754944e-38, %v644_v45  ;;  %vm643_vm2 = vcmp.eq.f32.partialorder %v642_v3, 8.507059e+37 }
0x1093   :  { %676 = vrot.lane.b32.xlu2 %v1062_v42, %s956_s5 }
0x1095   :  { %v845_v14 = vpop.eup %844 }
0x1096   :  { %v634_v9 = vmul.f32 %v845_v14, %v632_v63  ;;  %vm639_vm14 = vweird.f32 %v845_v14 }
0x1097   :  { %vm640_vm1 = vmor %vm638_vm15, %vm639_vm14 }
0x1098   :  { %v635_v0 = vsub.f32 1.0, %v634_v9 }
0x109a   :  { %v636_v1 = vmul.f32 %v845_v14, %v635_v0 }
0x109b   :  { %682 = vrot.lane.b32.xlu2 %v1123_v21, %s956_s5 }
0x109c   :  { %v637_v2 = vadd.f32 %v845_v14, %v636_v1 }
0x109e   :  { %v641_v42 = vsel %vm640_vm1, %v845_v14, %v637_v2 }
0x109f   :  { %v646_v11 = vsel %vm643_vm2, %v645_v4, %v641_v42 }
0x10a3   :  { %688 = vrot.lane.b32.xlu2 %v602_v55, %s956_s5 }
0x10e5   :  { %v652_v21 = vpop.permute.xlu2 %651 }
0x10e6   :  { %v654_v16 = vmul.f32 %v652_v21, %v646_v11 }
0x10e8   :  { %656 = vrot.lane.b32.xlu0 %v654_v16, %s957_s6 }
0x10ed   :  { %v677_v7 = vpop.permute.xlu2 %676 }
0x10ee   :  { %v700_v10 = vsel %vm69_vm0, %v1007_v6, %v677_v7  ;;  %v649_v6 = vmul.f32 %v646_v11, %v596_v51 }
0x10ef   :  { %709 = vst.msk [vmem:[#allocation10] sm:$0xff] %vm708_vm3, %v700_v10 }
0x10f0   :  { %678 = vrot.lane.b32.xlu0 %v1093_v17, %s956_s5 }
0x10f5   :  { %v683_v19 = vpop.permute.xlu2 %682 }
0x10f6   :  { %v703_v20 = vsel %vm69_vm0, %v1110_v46, %v683_v19 }
0x10f7   :  { %712 = vst.msk [vmem:[#allocation10 + $0x18] sm:$0xff] %vm708_vm3, %v703_v20 }
0x10f8   :  { %684 = vrot.lane.b32.xlu0 %v1133_v52, %s956_s5 }
0x10fd   :  { %v689_v22 = vpop.permute.xlu2 %688 }
0x10fe   :  { %v706_v23 = vsel %vm69_vm0, %v1081_v13, %v689_v22 }
0x10ff   :  { %715 = vst.msk [vmem:[#allocation10 + $0x30] sm:$0xff] %vm708_vm3, %v706_v23 }
0x115a   :  { %v657_v25 = vpop.permute.xlu0 %656 }
0x115b   :  { %v659_v26 = vadd.f32 %v657_v25, %v649_v6 }
0x115d   :  { %846 = vtanh.f32 %v659_v26  ;;  %672 = vrot.lane.b32.xlu2 %v659_v26, %s958_s3 }
0x1162   :  { %v679_v17 = vpop.permute.xlu0 %678 }
0x1163   :  { %v847_v27 = vpop.eup %846  ;;  %v701_v46 = vsel %vm69_vm0, %v1066_v43, %v679_v17 }
0x1164   :  { %710 = vst.msk [vmem:[#allocation10 + $0x8] sm:$0xff] %vm708_vm3, %v701_v46  ;;  %662 = vrot.lane.b32.xlu1 %v847_v27, %s956_s5 }
0x116a   :  { %v685_v52 = vpop.permute.xlu0 %684 }
0x116b   :  { %v704_v13 = vsel %vm69_vm0, %v1005_v5, %v685_v52 }
0x116c   :  { %713 = vst.msk [vmem:[#allocation10 + $0x20] sm:$0xff] %vm708_vm3, %v704_v13  ;;  %680 = vrot.lane.b32.xlu1 %v1114_v48, %s956_s5 }
0x1174   :  { %686 = vrot.lane.b32.xlu1 %v1143_v24, %s956_s5 }
0x11b7   :  { %v673_v28 = vpop.permute.xlu2 %672 }
0x11b8   :  { %675 = vst.msk [vmem:[#allocation3] sm:$0xff] %vm69_vm0, %v673_v28 }
0x11d6   :  { %v663_v43 = vpop.permute.xlu1 %662 }
0x11d7   :  { %v665_v29 = vmul.f32 %v663_v43, %v646_v11 }
0x11d9   :  { %667 = vrot.lane.b32.xlu1 %v665_v29, %s957_s6  ;;  %690 = vrot.lane.b32.xlu0 %v665_v29, %s956_s5 }
0x11de   :  { %v681_v30 = vpop.permute.xlu1 %680 }
0x11df   :  { %v702_v5 = vsel %vm69_vm0, %v1097_v18, %v681_v30 }
0x11e0   :  { %711 = vst.msk [vmem:[#allocation10 + $0x10] sm:$0xff] %vm708_vm3, %v702_v5 }
0x11e6   :  { %v687_v31 = vpop.permute.xlu1 %686 }
0x11e7   :  { %v705_v48 = vsel %vm69_vm0, %v1054_v40, %v687_v31 }
0x11e8   :  { %714 = vst.msk [vmem:[#allocation10 + $0x28] sm:$0xff] %vm708_vm3, %v705_v48 }
0x124b   :  { %v691_v24 = vpop.permute.xlu0 %690  ;;  %v668_v32 = vpop.permute.xlu1 %667 }
0x124c   :  { %v707_v18 = vsel %vm69_vm0, %v1087_v15, %v691_v24  ;;  %670 = vst.msk [vmem:[#allocation2] sm:$0xff] %vm69_vm0, %v668_v32 }
0x124d   :  { %716 = vst.msk [vmem:[#allocation10 + $0x38] sm:$0xff] %vm708_vm3, %v707_v18 }
0x124e   :  { %729 = dma.vmem_to_hbm [thread:$0]  %s722_s8, 1024, %s724_s11, [#allocation6], %s951_s23, %s951_s23, %s952_s24  }
0x124f   :  { %948 = dma.done.wait [#allocation6], 1024  }
0x1250   :  { %949 = vsyncadd [#allocation6], 4294966272 }
0x1251   :  { %734 = vsyncpa [#allocation5], 1 }
0x1252   :  { %735 = vsyncpa [#allocation8], 1 }
0x1253   :  { %736 = vsyncpa [#allocation6], 1 }

</bundles_post_ra>
